<compile_context>
chip_gen: v5e
topology: v5e:2x2
jax: 0.10.0
libtpu: 0.0.40
codegen_flags: <defaults>
</compile_context>

<pallas_src>
import functools
import re

import numpy as np
import jax
import jax.numpy as jnp
from jax import lax
from jax.experimental import pallas as pl
from jax.experimental.pallas import tpu as pltpu


_LANE = 128
_PAD_BIAS = -1.0e9   # affinity bias of padded pixels -> exp(-1e9) = 0


def _round_up(x, m):
    return (x + m - 1) // m * m


def _tpu_generation():
    """Best-effort TPU generation from device_kind; 0 if unknown."""
    try:
        kind = jax.devices()[0].device_kind.lower()
    except Exception:
        return 0
    m = re.search(r"(\d+)", kind)
    return int(m.group(1)) if m else 0


# ---------------------------------------------------------------------------
# Pallas kernel: one (Tp, Tq) upper-triangular tile pair per grid step.
# ---------------------------------------------------------------------------
def _nc_kernel(pi_ref, qi_ref, ap_ref, bq_ref, sp_ref, sq_ref, out_ref,
               num_acc, den_acc, *, num_classes, n_pt, exp_bf16):
    """Grid = (batch n, pair s); pairs are sorted by p-tile so each (n, p-tile)
    accumulator is produced by consecutive grid steps.

    pi_ref/qi_ref : SMEM int32[n_pairs]  scalar-prefetched (p-tile, q-tile) indices
    ap_ref : (1, T, DA2) bf16   p-side [a_hi, a_hi, a_lo] augmented features
    bq_ref : (1, DA2, T) bf16   q-side [b_hi, b_lo, b_hi] augmented features
    sp_ref : (1, KP, T) f32     rows [0,K): ROI-masked seg, row K: sum_k seg,
                                row K+1: ones (for W column sums), rest zeros
    sq_ref : (1, KP, T) f32     same array, q-tile slice
    out_ref: (1, 1, 2, T) f32   row 0: numer partial sums, row 1: denom partial sums
    num_acc/den_acc : (1, T) f32 VMEM scratch accumulators (persist across pairs)
    """
    s = pl.program_id(1)
    pi = pi_ref[s]
    qi = qi_ref[s]

    # First pair for this p-tile is the diagonal one (pi, pi) in sorted order.
    @pl.when(pi == qi)
    def _init():
        num_acc[...] = jnp.zeros_like(num_acc)
        den_acc[...] = jnp.zeros_like(den_acc)

    a = ap_ref[0]            # (T, DA2) bf16
    b = bq_ref[0]            # (DA2, T) bf16
    sp = sp_ref[0]           # (KP, T) f32
    sq = sq_ref[0]           # (KP, T) f32

    dims = (((1,), (0,)), ((), ()))

    # Single fused distance matmul (pre-split hi/lo features):
    #   A'.B' = a_hi.b_hi + a_hi.b_lo + a_lo.b_hi  ==  -0.5 * ||f_p - f_q||^2   (~HIGH)
    neg_half_d2 = lax.dot_general(a, b, dims,
                                  preferred_element_type=jnp.float32)   # (T, T)

    # W in [0, 1]; bf16 halves the footprint / doubles MXU rate of the depth-T matmul.
    # bf16 exp on v6e/v7x (bf16 EUP) is ~2x on the binding EUP slot; f32 on v5e.
    if exp_bf16:
        w = jnp.exp(neg_half_d2.astype(jnp.bfloat16))                    # (T, T) bf16
    else:
        w = jnp.exp(neg_half_d2).astype(jnp.bfloat16)                    # (T, T) bf16

    # m[r, q] = sum_p sp[r, p] * W[p, q]:
    #   rows [0,K): bilateral-filtered seg (numerator term)
    #   row K     : degree term  sum_p segsum[p] W[p,q]   (direct denominator)
    #   row K+1   : column sums  sum_p W[p,q]              (mirrored denominator)
    m = lax.dot_general(sp.astype(jnp.bfloat16), w, dims,
                        preferred_element_type=jnp.float32)              # (KP, T)

    k = num_classes
    diag = (pi == qi).astype(jnp.float32)   # 1.0 on diagonal tile pairs, else 0.0
    sym = 2.0 - diag                        # numer doubling for off-diagonal pairs
    off = 1.0 - diag                        # mirrored denom only for off-diagonal pairs

    numer_row = jnp.sum(m[:k, :] * sq[:k, :], axis=0, keepdims=True)     # (1, T)
    denom_row = m[k:k + 1, :] + off * (m[k + 1:k + 2, :] * sq[k:k + 1, :])

    num_acc[...] += numer_row * sym
    den_acc[...] += denom_row

    # Last pair for this p-tile is (pi, n_pt - 1): store the finished block once.
    @pl.when(qi == n_pt - 1)
    def _store():
        out_ref[0, 0, 0:1, :] = num_acc[...]
        out_ref[0, 0, 1:2, :] = den_acc[...]


def _nc_partial_sums(feats_a, feats_b, seg_aug, num_classes, tile,
                     exp_bf16, vmem_limit_bytes):
    n, p_pad, da2 = feats_a.shape
    kp = seg_aug.shape[1]
    n_pt = p_pad // tile

    # Upper-triangular (pi <= qi) tile-pair list, sorted by pi so that all pairs of a
    # given p-tile are consecutive grid steps (scratch accumulation + single store).
    pi_list, qi_list = [], []
    for pi in range(n_pt):
        for qi in range(pi, n_pt):
            pi_list.append(pi)
            qi_list.append(qi)
    pi_arr = jnp.asarray(pi_list, jnp.int32)
    qi_arr = jnp.asarray(qi_list, jnp.int32)
    n_pairs = len(pi_list)

    kernel = functools.partial(_nc_kernel, num_classes=num_classes,
                               n_pt=n_pt, exp_bf16=exp_bf16)
    return pl.pallas_call(
        kernel,
        out_shape=jax.ShapeDtypeStruct((n, n_pt, 2, tile), jnp.float32),
        grid_spec=pltpu.PrefetchScalarGridSpec(
            num_scalar_prefetch=2,
            grid=(n, n_pairs),
            in_specs=[
                pl.BlockSpec((1, tile, da2), lambda b, s, pi, qi: (b, pi[s], 0)),
                pl.BlockSpec((1, da2, tile), lambda b, s, pi, qi: (b, 0, qi[s])),
                pl.BlockSpec((1, kp, tile), lambda b, s, pi, qi: (b, 0, pi[s])),
                pl.BlockSpec((1, kp, tile), lambda b, s, pi, qi: (b, 0, qi[s])),
            ],
            out_specs=pl.BlockSpec((1, 1, 2, tile),
                                   lambda b, s, pi, qi: (b, pi[s], 0, 0)),
            scratch_shapes=[pltpu.VMEM((1, tile), jnp.float32),
                            pltpu.VMEM((1, tile), jnp.float32)],
        ),
        compiler_params=pltpu.CompilerParams(
            # Batch axis feeds megacore; the triangular pair axis is sequential (it
            # carries the per-p-tile accumulation order).
            dimension_semantics=("parallel", "arbitrary"),
            vmem_limit_bytes=vmem_limit_bytes),
    )(pi_arr, qi_arr, feats_a, feats_b, seg_aug, seg_aug)


# ---------------------------------------------------------------------------
# Wrapper-side preprocessing (PyTorch-matching interpolation, layout plumbing).
# ---------------------------------------------------------------------------
def _nearest_resize_pt(x, out_h, out_w):
    """PyTorch F.interpolate(mode='nearest'): src = floor(dst * in/out)."""
    h, w = x.shape[-2], x.shape[-1]
    ri = jnp.floor(jnp.arange(out_h) * (h / out_h)).astype(jnp.int32)
    ci = jnp.floor(jnp.arange(out_w) * (w / out_w)).astype(jnp.int32)
    return x[..., ri[:, None], ci[None, :]]


def _preprocess(images, segmentations, ROIs, sigma_rgb, sigma_xy, scale_factor):
    n, c, h, w = images.shape
    k = segmentations.shape[1]
    oh, ow = int(h * scale_factor), int(w * scale_factor)

    scaled_images = _nearest_resize_pt(images, oh, ow)
    scaled_segs = jax.image.resize(segmentations, (n, k, oh, ow),
                                   method="bilinear", antialias=False)
    scaled_rois = _nearest_resize_pt(ROIs, oh, ow)

    sigma_xy_s = sigma_xy * scale_factor
    seg_masked = scaled_segs * scaled_rois[:, None, :, :]

    p = oh * ow
    yy, xx = jnp.meshgrid(jnp.arange(oh, dtype=jnp.float32),
                          jnp.arange(ow, dtype=jnp.float32), indexing="ij")
    coords = jnp.stack([xx, yy], axis=0).reshape(2, p) / sigma_xy_s      # (2, P)
    feats_img = scaled_images.reshape(n, c, p) / sigma_rgb               # (N, C, P)
    feats = jnp.concatenate(
        [feats_img, jnp.broadcast_to(coords[None], (n, 2, p))], axis=1
    ).astype(jnp.float32)                                                # (N, C+2, P)
    seg_flat = seg_masked.reshape(n, k, p).astype(jnp.float32)           # (N, K, P)
    return feats, seg_flat, n


def _pack_for_kernel(feats, seg_flat, tile):
    """Pad / augment / hi-lo split / pre-transpose in XLA (layout plumbing only)."""
    n, df, p = feats.shape
    k = seg_flat.shape[1]
    p_pad = _round_up(p, tile)
    da = _round_up(df + 2, 8)
    pad = p_pad - p

    # Mean-center per image: pairwise distances are translation invariant, but smaller
    # magnitudes keep the Gram-identity distance well conditioned in the bf16 hi/lo split.
    feats = feats - jnp.mean(feats, axis=2, keepdims=True)
    neg_half_sq = -0.5 * jnp.sum(feats * feats, axis=1, keepdims=True)      # (N, 1, P)

    feats_pad = jnp.pad(feats, ((0, 0), (0, 0), (0, pad)))                  # zeros
    bias_pad = jnp.pad(neg_half_sq, ((0, 0), (0, 0), (0, pad)),
                       constant_values=_PAD_BIAS)
    ones_row = jnp.ones((n, 1, p_pad), jnp.float32)
    zero_rows = jnp.zeros((n, da - df - 2, p_pad), jnp.float32)

    # A_p . B_q = f_p.f_q - 0.5||f_p||^2 - 0.5||f_q||^2 = -0.5||f_p - f_q||^2;
    # padded pixels only carry the -1e9 bias, so every affinity touching them is 0.
    a_f32 = jnp.concatenate([feats_pad, bias_pad, ones_row, zero_rows], axis=1)
    b_f32 = jnp.concatenate([feats_pad, ones_row, bias_pad, zero_rows], axis=1)

    # bf16 hi/lo split (== Precision.HIGH), fused into one contraction:
    #   [a_hi, a_hi, a_lo] . [b_hi, b_lo, b_hi] = a_hi.b_hi + a_hi.b_lo + a_lo.b_hi
    a_hi = a_f32.astype(jnp.bfloat16)
    a_lo = (a_f32 - a_hi.astype(jnp.float32)).astype(jnp.bfloat16)
    b_hi = b_f32.astype(jnp.bfloat16)
    b_lo = (b_f32 - b_hi.astype(jnp.float32)).astype(jnp.bfloat16)

    da2 = _round_up(3 * da, 16)   # bf16-packing-friendly contraction depth (32 for da=8)
    zpad = jnp.zeros((n, da2 - 3 * da, p_pad), jnp.bfloat16)
    feats_a = jnp.concatenate([a_hi, a_hi, a_lo, zpad], axis=1)             # (N, DA2, Ppad)
    feats_b = jnp.concatenate([b_hi, b_lo, b_hi, zpad], axis=1)             # (N, DA2, Ppad)
    feats_a = jnp.transpose(feats_a, (0, 2, 1))          # (N, Ppad, DA2): p on sublanes

    seg_pad = jnp.pad(seg_flat, ((0, 0), (0, 0), (0, pad)))                 # zeros
    seg_sum = jnp.sum(seg_pad, axis=1, keepdims=True)                       # degree row
    col_ones = jnp.ones((n, 1, p_pad), jnp.float32)                         # W column-sum row
    kp = _round_up(k + 2, 8)
    seg_zeros = jnp.zeros((n, kp - k - 2, p_pad), jnp.float32)
    seg_aug = jnp.concatenate([seg_pad, seg_sum, col_ones, seg_zeros], axis=1)   # (N, KP, Ppad)
    # seg stays f32: it is reused on the VPU epilogue (sq); the in-kernel (KP, T) bf16
    # cast of sp for the matmul is negligible.
    return feats_a, feats_b, seg_aug.astype(jnp.float32)


def normalized_cut_loss(images, segmentations, ROIs, *,
                        weight, sigma_rgb, sigma_xy, scale_factor,
                        tile=1024, exp_bf16=None):
    feats, seg_flat, n = _preprocess(images, segmentations, ROIs,
                                     sigma_rgb, sigma_xy, scale_factor)
    p = feats.shape[2]
    k = seg_flat.shape[1]

    gen = _tpu_generation()
    if exp_bf16 is None:
        exp_bf16 = gen >= 6                     # bf16 EUP on v6e/v7x; f32 exp on v5e
    tile = max(_LANE, (int(tile) // _LANE) * _LANE)   # enforce lane multiple
    if gen >= 7:
        tile = min(tile, 1024)                  # v7x: 64 MiB VMEM, cap the tile
    tile = min(tile, _round_up(p, _LANE))       # never exceed the padded pixel count
    vmem_limit_bytes = (48 if gen >= 7 else 96) * 1024 * 1024

    feats_a, feats_b, seg_aug = _pack_for_kernel(feats, seg_flat, tile)
    sums = _nc_partial_sums(feats_a, feats_b, seg_aug, k, tile,
                            exp_bf16, vmem_limit_bytes)        # (N, Ppad/T, 2, T)
    numer = jnp.sum(sums[:, :, 0, :])
    denom = jnp.sum(sums[:, :, 1, :])
    # Same aggregation as the PyTorch module: ratio of whole-batch flattened sums.
    ncloss = -numer / denom / n
    return (weight * ncloss).reshape(1).astype(jnp.float32)


# Pure-JAX reference (same math, dense, no Pallas) -- used to validate the kernel.
def normalized_cut_loss_ref(images, segmentations, ROIs, *,
                            weight, sigma_rgb, sigma_xy, scale_factor):
    feats, seg_flat, n = _preprocess(images, segmentations, ROIs,
                                     sigma_rgb, sigma_xy, scale_factor)
    diff = feats[:, :, :, None] - feats[:, :, None, :]          # (N, DF, P, P)
    wmat = jnp.exp(-0.5 * jnp.sum(diff * diff, axis=1))         # (N, P, P)
    as_ = jnp.einsum("npq,nkq->nkp", wmat, seg_flat,
                     precision=lax.Precision.HIGHEST)           # (N, K, P)
    numer = jnp.sum(seg_flat * as_)
    d = jnp.sum(wmat, axis=2)                                   # (N, P)
    denom = jnp.sum(d[:, None, :] * seg_flat)
    ncloss = -numer / denom / n
    return (weight * ncloss).reshape(1).astype(jnp.float32)


# ---------------------------------------------------------------------------
if __name__ == "__main__":
    key = jax.random.PRNGKey(0)
    k1, k2, k3 = jax.random.split(key, 3)

    # Small deterministic inputs consistent with the module's forward (NCHW).
    # H=W=30, scale 0.5 -> 15x15 = 225 pixels, padded to 256: with tile=128 the kernel
    # runs a 2x2 tile grid, exercising the triangular-symmetry path, multi-pair
    # accumulation and pad-pixel masking against the dense reference.
    N, C, H, W, K = 2, 3, 30, 30, 4
    images = jax.random.uniform(k1, (N, C, H, W), jnp.float32, 0.0, 255.0)
    segmentations = jax.nn.softmax(jax.random.normal(k2, (N, K, H, W), jnp.float32), axis=1)
    ROIs = (jax.random.uniform(k3, (N, H, W)) > 0.3).astype(jnp.float32)

    # Module "parameters" (constructor args), fixed deterministically in-script.
    weight, sigma_rgb, sigma_xy, scale_factor = 1e-4, 15.0, 80.0, 0.5

    ref = normalized_cut_loss_ref(images, segmentations, ROIs,
                                  weight=weight, sigma_rgb=sigma_rgb,
                                  sigma_xy=sigma_xy, scale_factor=scale_factor)

    # Structural check with f32 exp: tight tolerance (bf16 W / fused hi-lo distance only).
    loss_f32 = normalized_cut_loss(images, segmentations, ROIs,
                                   weight=weight, sigma_rgb=sigma_rgb,
                                   sigma_xy=sigma_xy, scale_factor=scale_factor,
                                   tile=128, exp_bf16=False)
    loss_f32 = jax.block_until_ready(loss_f32)
    np.testing.assert_allclose(np.asarray(loss_f32), np.asarray(ref),
                               rtol=5e-3, atol=1e-9)

    # Device-default config (bf16 exp on v6e/v7x): looser tolerance for the bf16 exponent.
    loss = normalized_cut_loss(images, segmentations, ROIs,
                               weight=weight, sigma_rgb=sigma_rgb,
                               sigma_xy=sigma_xy, scale_factor=scale_factor, tile=128)
    loss = jax.block_until_ready(loss)
    np.testing.assert_allclose(np.asarray(loss), np.asarray(ref),
                               rtol=2.5e-2, atol=1e-9)

    print("KERNEL_OK")
</pallas_src>

<mosaic_0001>
module attributes {stable_mosaic.version = 11 : i64} {
  func.func @_nc_kernel(%arg0: i32, %arg1: i32, %arg2: memref<3xi32, #tpu.memory_space<smem>>, %arg3: memref<3xi32, #tpu.memory_space<smem>>, %arg4: memref<1x128x32xbf16, #tpu.memory_space<vmem>>, %arg5: memref<1x32x128xbf16, #tpu.memory_space<vmem>>, %arg6: memref<1x8x128xf32, #tpu.memory_space<vmem>>, %arg7: memref<1x8x128xf32, #tpu.memory_space<vmem>>, %arg8: memref<1x1x2x128xf32, #tpu.memory_space<vmem>>, %arg9: memref<1x128xf32, #tpu.memory_space<vmem>>, %arg10: memref<1x128xf32, #tpu.memory_space<vmem>>) attributes {dimension_semantics = [#tpu.dimension_semantics<parallel>, #tpu.dimension_semantics<arbitrary>], iteration_bounds = array<i64: 2, 3>, scalar_prefetch = 2 : i64, scratch_operands = 2 : i64, tpu.core_type = #tpu.core_type<tc>, window_params = [{transform_indices = @transform_0, window_bounds = array<i64: 1, 128, 32>}, {transform_indices = @transform_1, window_bounds = array<i64: 1, 32, 128>}, {transform_indices = @transform_2, window_bounds = array<i64: 1, 8, 128>}, {transform_indices = @transform_3, window_bounds = array<i64: 1, 8, 128>}, {transform_indices = @transform_4, window_bounds = array<i64: 1, 1, 2, 128>}]} {
    %0 = arith.index_cast %arg1 : i32 to index
    %1 = memref.load %arg2[%0] : memref<3xi32, #tpu.memory_space<smem>>
    %2 = arith.index_cast %arg1 : i32 to index
    %3 = memref.load %arg3[%2] : memref<3xi32, #tpu.memory_space<smem>>
    %4 = arith.cmpi eq, %1, %3 : i32
    %5 = arith.extui %4 : i1 to i32
    %c0_i32 = arith.constant 0 : i32
    %6 = arith.cmpi ne, %5, %c0_i32 : i32
    scf.if %6 {
      %cst_24 = arith.constant 0.000000e+00 : f32
      %48 = vector.broadcast %cst_24 : f32 to vector<1x128xf32>
      %c0_25 = arith.constant 0 : index
      %c0_26 = arith.constant 0 : index
      %49 = vector.load %arg9[%c0_25, %c0_26] : memref<1x128xf32, #tpu.memory_space<vmem>>, vector<1x128xf32>
      tpu.vector_store %arg9[%c0_25, %c0_26], %48 {strides = array<i32>} : memref<1x128xf32, #tpu.memory_space<vmem>>, vector<1x128xf32>,
      %cst_27 = arith.constant 0.000000e+00 : f32
      %50 = vector.broadcast %cst_27 : f32 to vector<1x128xf32>
      %c0_28 = arith.constant 0 : index
      %c0_29 = arith.constant 0 : index
      %51 = vector.load %arg10[%c0_28, %c0_29] : memref<1x128xf32, #tpu.memory_space<vmem>>, vector<1x128xf32>
      tpu.vector_store %arg10[%c0_28, %c0_29], %50 {strides = array<i32>} : memref<1x128xf32, #tpu.memory_space<vmem>>, vector<1x128xf32>,
    } else {
    }
    %c0 = arith.constant 0 : index
    %c0_0 = arith.constant 0 : index
    %c0_1 = arith.constant 0 : index
    %7 = vector.load %arg4[%c0, %c0_0, %c0_1] : memref<1x128x32xbf16, #tpu.memory_space<vmem>>, vector<1x128x32xbf16>
    %8 = vector.shape_cast %7 : vector<1x128x32xbf16> to vector<128x32xbf16>
    %c0_2 = arith.constant 0 : index
    %c0_3 = arith.constant 0 : index
    %c0_4 = arith.constant 0 : index
    %9 = vector.load %arg5[%c0_2, %c0_3, %c0_4] : memref<1x32x128xbf16, #tpu.memory_space<vmem>>, vector<1x32x128xbf16>
    %10 = vector.shape_cast %9 : vector<1x32x128xbf16> to vector<32x128xbf16>
    %c0_5 = arith.constant 0 : index
    %c0_6 = arith.constant 0 : index
    %c0_7 = arith.constant 0 : index
    %11 = vector.load %arg6[%c0_5, %c0_6, %c0_7] : memref<1x8x128xf32, #tpu.memory_space<vmem>>, vector<1x8x128xf32>
    %12 = vector.shape_cast %11 : vector<1x8x128xf32> to vector<8x128xf32>
    %c0_8 = arith.constant 0 : index
    %c0_9 = arith.constant 0 : index
    %c0_10 = arith.constant 0 : index
    %13 = vector.load %arg7[%c0_8, %c0_9, %c0_10] : memref<1x8x128xf32, #tpu.memory_space<vmem>>, vector<1x8x128xf32>
    %14 = vector.shape_cast %13 : vector<1x8x128xf32> to vector<8x128xf32>
    %cst = arith.constant dense<0.000000e+00> : vector<128x128xf32>
    %15 = tpu.matmul %8, %10, %cst {dimension_numbers = #tpu.dot_dimension_numbers<[1], [0], [0], [1], [0, 0, 1, 1], [], []>} : vector<128x32xbf16>, vector<32x128xbf16>, vector<128x128xf32> -> vector<128x128xf32>
    %16 = math.exp %15 : vector<128x128xf32>
    %17 = arith.truncf %16 : vector<128x128xf32> to vector<128x128xbf16>
    %18 = arith.truncf %12 : vector<8x128xf32> to vector<8x128xbf16>
    %cst_11 = arith.constant dense<0.000000e+00> : vector<8x128xf32>
    %19 = tpu.matmul %18, %17, %cst_11 {dimension_numbers = #tpu.dot_dimension_numbers<[1], [0], [0], [1], [0, 0, 1, 1], [], []>} : vector<8x128xbf16>, vector<128x128xbf16>, vector<8x128xf32> -> vector<8x128xf32>
    %20 = arith.cmpi eq, %1, %3 : i32
    %21 = arith.extui %20 : i1 to i32
    %22 = arith.sitofp %21 : i32 to f32
    %cst_12 = arith.constant 2.000000e+00 : f32
    %23 = arith.subf %cst_12, %22 : f32
    %cst_13 = arith.constant 1.000000e+00 : f32
    %24 = arith.subf %cst_13, %22 : f32
    %25 = vector.extract_strided_slice %19 {offsets = [0, 0], sizes = [4, 128], strides = [1, 1]} : vector<8x128xf32> to vector<4x128xf32>
    %26 = vector.extract_strided_slice %14 {offsets = [0, 0], sizes = [4, 128], strides = [1, 1]} : vector<8x128xf32> to vector<4x128xf32>
    %27 = arith.mulf %25, %26 : vector<4x128xf32>
    %cst_14 = arith.constant dense<0.000000e+00> : vector<128xf32>
    %28 = vector.multi_reduction <add>, %27, %cst_14 [0] : vector<4x128xf32> to vector<128xf32>
    %29 = vector.shape_cast %28 : vector<128xf32> to vector<1x128xf32>
    %30 = vector.extract_strided_slice %19 {offsets = [4, 0], sizes = [1, 128], strides = [1, 1]} : vector<8x128xf32> to vector<1x128xf32>
    %31 = vector.extract_strided_slice %19 {offsets = [5, 0], sizes = [1, 128], strides = [1, 1]} : vector<8x128xf32> to vector<1x128xf32>
    %32 = vector.extract_strided_slice %14 {offsets = [4, 0], sizes = [1, 128], strides = [1, 1]} : vector<8x128xf32> to vector<1x128xf32>
    %33 = arith.mulf %31, %32 : vector<1x128xf32>
    %34 = vector.broadcast %24 : f32 to vector<1x128xf32>
    %35 = arith.mulf %34, %33 : vector<1x128xf32>
    %36 = arith.addf %30, %35 : vector<1x128xf32>
    %c0_15 = arith.constant 0 : index
    %c0_16 = arith.constant 0 : index
    %37 = vector.load %arg9[%c0_15, %c0_16] : memref<1x128xf32, #tpu.memory_space<vmem>>, vector<1x128xf32>
    %38 = vector.broadcast %23 : f32 to vector<1x128xf32>
    %39 = arith.mulf %29, %38 : vector<1x128xf32>
    %40 = arith.addf %37, %39 : vector<1x128xf32>
    %c0_17 = arith.constant 0 : index
    %c0_18 = arith.constant 0 : index
    %41 = vector.load %arg9[%c0_17, %c0_18] : memref<1x128xf32, #tpu.memory_space<vmem>>, vector<1x128xf32>
    tpu.vector_store %arg9[%c0_17, %c0_18], %40 {strides = array<i32>} : memref<1x128xf32, #tpu.memory_space<vmem>>, vector<1x128xf32>,
    %c0_19 = arith.constant 0 : index
    %c0_20 = arith.constant 0 : index
    %42 = vector.load %arg10[%c0_19, %c0_20] : memref<1x128xf32, #tpu.memory_space<vmem>>, vector<1x128xf32>
    %43 = arith.addf %42, %36 : vector<1x128xf32>
    %c0_21 = arith.constant 0 : index
    %c0_22 = arith.constant 0 : index
    %44 = vector.load %arg10[%c0_21, %c0_22] : memref<1x128xf32, #tpu.memory_space<vmem>>, vector<1x128xf32>
    tpu.vector_store %arg10[%c0_21, %c0_22], %43 {strides = array<i32>} : memref<1x128xf32, #tpu.memory_space<vmem>>, vector<1x128xf32>,
    %c1_i32 = arith.constant 1 : i32
    %45 = arith.cmpi eq, %3, %c1_i32 : i32
    %46 = arith.extui %45 : i1 to i32
    %c0_i32_23 = arith.constant 0 : i32
    %47 = arith.cmpi ne, %46, %c0_i32_23 : i32
    scf.if %47 {
      %c0_24 = arith.constant 0 : index
      %c0_25 = arith.constant 0 : index
      %48 = vector.load %arg9[%c0_24, %c0_25] : memref<1x128xf32, #tpu.memory_space<vmem>>, vector<1x128xf32>
      %c0_26 = arith.constant 0 : index
      %c0_27 = arith.constant 0 : index
      %c0_28 = arith.constant 0 : index
      %c0_29 = arith.constant 0 : index
      %49 = vector.load %arg8[%c0_26, %c0_27, %c0_28, %c0_29] : memref<1x1x2x128xf32, #tpu.memory_space<vmem>>, vector<1x1x1x128xf32>
      %50 = vector.shape_cast %49 : vector<1x1x1x128xf32> to vector<1x128xf32>
      %51 = vector.shape_cast %48 : vector<1x128xf32> to vector<1x1x1x128xf32>
      tpu.vector_store %arg8[%c0_26, %c0_27, %c0_28, %c0_29], %51 {strides = array<i32>} : memref<1x1x2x128xf32, #tpu.memory_space<vmem>>, vector<1x1x1x128xf32>,
      %c0_30 = arith.constant 0 : index
      %c0_31 = arith.constant 0 : index
      %52 = vector.load %arg10[%c0_30, %c0_31] : memref<1x128xf32, #tpu.memory_space<vmem>>, vector<1x128xf32>
      %c0_32 = arith.constant 0 : index
      %c0_33 = arith.constant 0 : index
      %c1 = arith.constant 1 : index
      %c0_34 = arith.constant 0 : index
      %53 = vector.load %arg8[%c0_32, %c0_33, %c1, %c0_34] : memref<1x1x2x128xf32, #tpu.memory_space<vmem>>, vector<1x1x1x128xf32>
      %54 = vector.shape_cast %53 : vector<1x1x1x128xf32> to vector<1x128xf32>
      %55 = vector.shape_cast %52 : vector<1x128xf32> to vector<1x1x1x128xf32>
      tpu.vector_store %arg8[%c0_32, %c0_33, %c1, %c0_34], %55 {strides = array<i32>} : memref<1x1x2x128xf32, #tpu.memory_space<vmem>>, vector<1x1x1x128xf32>,
    } else {
    }
    return
  }
  func.func @transform_0(%arg0: i32, %arg1: i32, %arg2: memref<3xi32, #tpu.memory_space<smem>>, %arg3: memref<3xi32, #tpu.memory_space<smem>>) -> (i32, i32, i32) {
    %0 = arith.index_cast %arg1 : i32 to index
    %1 = memref.load %arg2[%0] : memref<3xi32, #tpu.memory_space<smem>>
    %c0_i32 = arith.constant 0 : i32
    %c0_i32_0 = arith.constant 0 : i32
    return %arg0, %1, %c0_i32 : i32, i32, i32
  }
  func.func @transform_1(%arg0: i32, %arg1: i32, %arg2: memref<3xi32, #tpu.memory_space<smem>>, %arg3: memref<3xi32, #tpu.memory_space<smem>>) -> (i32, i32, i32) {
    %0 = arith.index_cast %arg1 : i32 to index
    %1 = memref.load %arg3[%0] : memref<3xi32, #tpu.memory_space<smem>>
    %c0_i32 = arith.constant 0 : i32
    %c0_i32_0 = arith.constant 0 : i32
    return %arg0, %c0_i32, %1 : i32, i32, i32
  }
  func.func @transform_2(%arg0: i32, %arg1: i32, %arg2: memref<3xi32, #tpu.memory_space<smem>>, %arg3: memref<3xi32, #tpu.memory_space<smem>>) -> (i32, i32, i32) {
    %0 = arith.index_cast %arg1 : i32 to index
    %1 = memref.load %arg2[%0] : memref<3xi32, #tpu.memory_space<smem>>
    %c0_i32 = arith.constant 0 : i32
    %c0_i32_0 = arith.constant 0 : i32
    return %arg0, %c0_i32, %1 : i32, i32, i32
  }
  func.func @transform_3(%arg0: i32, %arg1: i32, %arg2: memref<3xi32, #tpu.memory_space<smem>>, %arg3: memref<3xi32, #tpu.memory_space<smem>>) -> (i32, i32, i32) {
    %0 = arith.index_cast %arg1 : i32 to index
    %1 = memref.load %arg3[%0] : memref<3xi32, #tpu.memory_space<smem>>
    %c0_i32 = arith.constant 0 : i32
    %c0_i32_0 = arith.constant 0 : i32
    return %arg0, %c0_i32, %1 : i32, i32, i32
  }
  func.func @transform_4(%arg0: i32, %arg1: i32, %arg2: memref<3xi32, #tpu.memory_space<smem>>, %arg3: memref<3xi32, #tpu.memory_space<smem>>) -> (i32, i32, i32, i32) {
    %0 = arith.index_cast %arg1 : i32 to index
    %1 = memref.load %arg2[%0] : memref<3xi32, #tpu.memory_space<smem>>
    %c0_i32 = arith.constant 0 : i32
    %c0_i32_0 = arith.constant 0 : i32
    %c0_i32_1 = arith.constant 0 : i32
    return %arg0, %1, %c0_i32, %c0_i32_0 : i32, i32, i32, i32
  }
}

</mosaic_0001>

<bundles_post_ra>
// kernel: tpu_custom_call.1
= control target key start
LH: loop header
LB: loop body
LE: loop exit
PB: predicated region body
PF: predicated region fallthrough
CT: control target
= control target key end

     0   :  { %s1166_s27 = smov [#allocation5]   ;;  %s1167_s28 = smov [#allocation6]   ;;  %s1424_s0 = inlined_call_operand.vmem [shape: s32[3], index: 0, kind: input, shape index: {}]   ;;  %s1425_s2 = inlined_call_operand.vmem [shape: bf16[2,256,32], index: 2, kind: input, shape index: {}]   ;;  %s1426_s3 = inlined_call_operand.vmem [shape: bf16[2,32,256], index: 3, kind: input, shape index: {}]   ;;  %s1427_s4 = inlined_call_operand.vmem [shape: f32[2,8,256], index: 4, kind: input, shape index: {}]   ;;  %s1428_s5 = inlined_call_operand.vmem [shape: f32[2,8,256], index: 5, kind: input, shape index: {}]   ;;  %s1429_s6 = inlined_call_operand.hbm [shape: f32[2,2,2,128], index: 6, kind: output, shape index: {}]   ;;  %s1430_s1 = inlined_call_operand.vmem [shape: s32[3], index: 1, kind: input, shape index: {}]  }
   0x1   :  { %1440 = sst [smem:[#allocation22_spill]] %s1426_s3  ;;  %s12_s23 = sshll.u32 %s1424_s0, 4  ;;  %s13_s23 = int_to_ptr.vmem [resolvable:$true] %s12_s23 }
   0x2   :  { %1441 = sst [smem:[#allocation23_spill]] %s1428_s5  ;;  %s17_s26 = sshll.u32 %s1430_s1, 4  ;;  %s18_s26 = int_to_ptr.vmem [resolvable:$true] %s17_s26 }
   0x3   :  { %1442 = sst [smem:[#allocation24_spill]] %s1429_s6 }
   0x4   :  { %15 = dma.vmem_to_smem %s13_s23, 16, %s1166_s27, [#allocation4] }
   0x5   :  { %20 = dma.vmem_to_smem %s18_s26, 16, %s1167_s28, [#allocation4] }
   0x6   :  { %1120 = dma.done.wait [#allocation4], 32 }
   0x7   :  { %1121 = vsyncadd [#allocation4], 4294967264 }
   0x8   :  { %23 = sfence }
   0x9   :  { %24 = vsyncpa [#allocation9], 0 }
   0xa   :  { %26 = vsyncpa [#allocation9 + $0x1], 0  ;;  %s1210_s29 = smov 0   ;;  %s1212_s30 = smov 0  }
   0xb   :  { %s1214_s0 = smov 0   ;;  %s1216_s7 = smov 0  }
   0xc   :  { %s1218_s1 = smov 0   ;;  %s1220_s8 = smov 0  }
   0xd   :  { %s1222_s9 = smov 0   ;;  %s1224_s10 = smov 0  }
   0xe   :  { %s1226_s11 = smov 0   ;;  %s1228_s12 = smov 0  }
   0xf LB: > { %1443 = sst [smem:[#allocation13_spill]] %s1136_s0  ;;  %s818_s13 = sadd.s32 4294967295, %s1164_s12   ;;  %s1164_s12 = sphi %s1228_s12, %s32_s12   ;;  %s1160_s11 = sphi %s1226_s11, %s1467_s11   ;;  %s1156_s10 = sphi %s1224_s10, %s1470_s10   ;;  %s1152_s9 = sphi %s1222_s9, %s1465_s9   ;;  %s1148_s8 = sphi %s1220_s8, %s1464_s8   ;;  %s1144_s1 = sphi %s1218_s1, %s1463_s1   ;;  %s1140_s7 = sphi %s1216_s7, %s1462_s7   ;;  %s1136_s0 = sphi %s1214_s0, %s1461_s0   ;;  %s1132_s30 = sphi %s1212_s30, %s1469_s30   ;;  %s1128_s29 = sphi %s1210_s29, %s1468_s29  }
  0x10   : > { %1444 = sst [smem:[#allocation14_spill]] %s1144_s1  ;;  %s819_s14 = sadd.s32 4294967294, %s1164_s12  }
  0x11   : > { %1445 = sst [smem:[#allocation15_spill]] %s1156_s10  ;;  %s41_s15 = sadd.s32 1, %s1156_s10 }
  0x12   : > { %1446 = sst [smem:[#allocation16_spill]] %s1160_s11  ;;  %s44_s16 = sadd.s32 1, %s1160_s11 }
  0x13   : > { %p42_p0 = scmp.ge.s32.totalorder %s41_s15, 3  ;;  %s78_s17 = sld [smem:[#allocation6 + %s1156_s10]] }
  0x14   : > { %s85_s18 = sadd.s32 1, %s1144_s1  ;;  %p92_p1 = scmp.ne.s32.totalorder %s1144_s1, %s1140_s7 }
  0x15   : > { %s1472_s15 = smov (%p42_p0, %s41_s15), 0  ;;  %s1474_s16 = smov (!%p42_p0, %s44_s16), %s1160_s11 }
  0x16   : > { %1447 = sst [smem:[#allocation17_spill]] %s1472_s15  ;;  %p93_p2 = scmp.eq.s32.totalorder %s1164_s12, 0 }
  0x17   : > { %s79_s19 = sld [smem:[#allocation6 + %s1472_s15]]  ;;  %p46_p3 = scmp.ge.s32.totalorder %s1474_s16, 2 }
  0x18   : > { %s168_s20 = sld [smem:[#allocation5 + %s1156_s10]]  ;;  %p1274_p4 = por %p93_p2, %p92_p1 }
  0x19   : > { %s169_s22 = sld [smem:[#allocation5 + %s1472_s15]]  ;;  %s1476_s16 = smov (%p46_p3, %s1474_s16), 0 }
  0x1a   : > { %1449 = sst [smem:[#allocation18_spill]] %s1476_s16  ;;  %s175_s23 = sadd.s32 1, %s1136_s0 }
  0x1b   : > { %p185_p5 = scmp.ne.s32.totalorder %s1136_s0, %s1132_s30  ;;  %s80_s24 = ssub.s32 %s1160_s11, %s1476_s16 }
  0x1c   : > { %p186_p6 = scmp.eq.s32.totalorder %s818_s13, 5  ;;  %p191_p7 = scmp.ne.s32.totalorder %s1132_s30, %s1128_s29 }
  0x1d   : > { %s81_s25 = ssub.s32 %s78_s17, %s79_s19  ;;  %p192_p10 = scmp.eq.s32.totalorder %s819_s14, 5 }
  0x1e   : > { %s82_s26 = sor.u32 %s81_s25, %s80_s24  ;;  %p1288_p8 = por %p186_p6, %p185_p5 }
  0x1f   : > { %p83_p9 = scmp.eq.s32.totalorder %s82_s26, 0  ;;  %s171_s28 = ssub.s32 %s168_s20, %s169_s22 }
  0x20   : > { %s172_s6 = sor.u32 %s171_s28, %s80_s24  ;;  %p1295_p12 = por %p192_p10, %p191_p7 }
  0x21   : > { %s1293_s15 = scalar_select %p83_p9, %s1144_s1, %s85_s18  }
  0x22   : > { %p173_p11 = scmp.eq.s32.totalorder %s172_s6, 0  ;;  %p821_p13 = scmp.ge.s32.totalorder %s1164_s12, 6 }
  0x23   : > { %1451 = sst [smem:[#allocation19_spill]] %s1293_s15 }
  0x24   : > { %s1452_s5 = scalar_select %p1295_p12, 1, 0 }
  0x25   : > { %s1300_s16 = scalar_select %p173_p11, %s1136_s0, %s175_s23  }
  0x26   : > { %1453 = sst [smem:[#allocation20_spill]] %s1452_s5  ;;  %208 = sbr.rel (%p821_p13) target bundleno = 57 (0x39), region = 16 }
  0x27   : > { %1454 = sst [smem:[#allocation21_spill]] %s1300_s16 }
  0x2b   : > { %226 = sbr.rel (!%p1274_p4) target bundleno = 57 (0x39), region = 24  ;;  %s231_s13 = sld [smem:[#allocation6 + %s1156_s10]] (%p1274_p4) }
  0x2c   : > { %s228_s14 = sand.u32 (%p1274_p4), 1, %s1144_s1   ;;  %s823_s17 = sshll.u32 (%p1274_p4), %s1160_s11, 3 }
  0x2d   : > { %s822_s18 = sshll.u32 (%p1274_p4), %s228_s14, 4  ;;  %s1455_s3 = sld [smem:[#allocation22_spill]] (%p1274_p4) }
  0x2e   : > { %s230_s24 = scalar_lea.vmem (%p1274_p4), [#allocation7], %s822_s18 }
  0x31   : > { %s233_s6 = sadd.s32 %s823_s17, %s231_s13 }
  0x32   : > { %s824_s19 = sshll.u32 %s233_s6, 2 }
  0x33   : > { %s235_s23 = scalar_lea.vmem %s1455_s3, %s824_s19 }
  0x34   : > { %v252_v0 = vld [vmem:[%s235_s23] sm:$0xf]  ;;  %v254_v1 = vld [vmem:[%s235_s23 + $0x8] sm:$0xf]  ;;  %v256_v2 = vld [vmem:[%s235_s23 + $0x10] sm:$0xf] }
  0x35   : > { %253 = vst [vmem:[%s230_s24] sm:$0xf] %v252_v0  ;;  %v258_v3 = vld [vmem:[%s235_s23 + $0x18] sm:$0xf] }
  0x36   : > { %255 = vst [vmem:[%s230_s24 + $0x4] sm:$0xf] %v254_v1 }
  0x37   : > { %257 = vst [vmem:[%s230_s24 + $0x8] sm:$0xf] %v256_v2 }
  0x38   : > { %259 = vst [vmem:[%s230_s24 + $0xc] sm:$0xf] %v258_v3 }
  0x39 PF: > { %p825_p0 = scmp.ge.s32.totalorder %s1164_s12, 1  ;;  %p316_p1 = scmp.lt.s32.totalorder %s1164_s12, 7 }
  0x3b   : > { %p317_p2 = pnand %p825_p0, %p316_p1 }
  0x3c   : > { %s323_s21 = sand.u32 (!%p317_p2), 1, %s1140_s7   ;;  %s1434_s25 = sand.u32 (!%p317_p2), 1, %s1132_s30  }
  0x3d   : > { %320 = sbr.rel (%p317_p2) target bundleno = 480 (0x1e0), region = 73  ;;  %s1315_s26 = sshll.u32 (!%p317_p2), %s323_s21, 4 }
  0x3e   : > { %s827_s28 = sshll.u32 (!%p317_p2), %s1434_s25, 1  ;;  %s376_s13 = sld [smem:[#allocation5 + %s1148_s8]] (!%p317_p2) }
  0x3f   : > { %p378_p3 = scmp.lt.s32.totalorder (!%p317_p2), %s1152_s9, 1  ;;  %s389_s14 = sld [smem:[#allocation5 + %s1148_s8]] (!%p317_p2) }
  0x40   : > { %s399_s17 = sld [smem:[#allocation6 + %s1148_s8]] (!%p317_p2)  ;;  %s1348_s5 = scalar_lea.vmem (!%p317_p2), [#allocation8], %s827_s28 }
  0x41   : > { %s1325_s6 = sld [smem:[#allocation5 + %s1148_s8]] (!%p317_p2) }
  0x42   : > { %s379_s18 = scalar_select %p378_p3, %s1152_s9, 1 }
  0x43   : > { %s1328_s20 = sld [smem:[#allocation6 + %s1148_s8]] }
  0x44   : > { %s828_s19 = sshll.u32 %s376_s13, 4  ;;  %s829_s7 = sshll.u32 %s379_s18, 5 }
  0x45   : > { %p380_p4 = scmp.lt.s32.totalorder %s828_s19, 31  ;;  %p392_p5 = scmp.lt.s32.totalorder %s389_s14, 1 }
  0x46   : > { %s831_s22 = sshll.u32 %s379_s18, 1  ;;  %p402_p6 = scmp.lt.s32.totalorder %s399_s17, 1 }
  0x47   : > { %s1478_s19 = smov (!%p380_p4, %s828_s19), 31  ;;  %s1480_s14 = smov (!%p392_p5, %s389_s14), 1 }
  0x48   : > { %s383_s23 = sadd.s32 %s829_s7, %s1478_s19  ;;  %s395_s21 = sadd.s32 %s831_s22, %s1480_s14 }
  0x49   : > { %s830_s24 = sshll.u32 %s383_s23, 2  ;;  %s832_s13 = sshll.u32 %s395_s21, 3 }
  0x4a   : > { %s1333_s11 = scalar_lea.vmem %s1425_s2, %s830_s24  ;;  %s1338_s1 = scalar_lea.vmem %s1427_s4, %s832_s13 }
  0x4b   : > { %p413_p7 = scmp.eq.s32.totalorder %s1325_s6, %s1328_s20  ;;  %s1482_s17 = smov (!%p402_p6, %s399_s17), 1 }
  0x4c   : > { %s405_s18 = sadd.s32 %s831_s22, %s1482_s17  ;;  %s1456_s7 = sld [smem:[#allocation23_spill]] }
  0x4d   : > { %s834_s16 = sshll.u32 %s405_s18, 3  ;;  %s325_s14 = scalar_lea.vmem [#allocation7], %s1315_s26 }
  0x4e   : > { %p835_p9 = scmp.ne.s32.totalorder %s1325_s6, %s1328_s20 }
  0x50   : > { %416 = sbr.rel (%p835_p9) target bundleno = 88 (0x58), region = 81 }
  0x52   : > { %s1345_s23 = scalar_lea.vmem %s1456_s7, %s834_s16 }
  0x55   : > { %v1168_v4 = vmov 0.0  }
  0x56   : > { %417 = vst [vmem:[#allocation2] sm:$0x1] %v1168_v4 }
  0x57   : > { %418 = vst [vmem:[#allocation3] sm:$0x1] %v1168_v4 }
  0x58 PF: > { %v899_v5 = vld [vmem:[%s325_s14 + $0x8] sm:$0xff]  ;;  %v898_v6 = vld [vmem:[%s325_s14] sm:$0xff]  ;;  %vm493_vm0 = vcmask 261120   ;;  %s621_s3 = scalar_select %p413_p7, 1, 0  ;;  %vm626_vm1 = vcmask 1043456  }
  0x59   : > { %900 = vmatpush.bf16.msra.mxu2 %v899_v5  ;;  %901 = vmatpush.bf16.msra.mxu3 %v899_v5  ;;  %v893_v7 = vld [vmem:[%s1333_s11 + $0x18] sm:$0xff]  ;;  %v896_v8 = vld [vmem:[%s1333_s11 + $0x30] sm:$0xff]  ;;  %v890_v9 = vld [vmem:[%s1333_s11] sm:$0xff]  ;;  %p884_p10 = scmp.ne.s32.totalorder %s1328_s20, 1 }
  0x5a   : > { %524 = vmatpush.bf16.msra.mxu0 %v899_v5  ;;  %v894_v10 = vld [vmem:[%s1333_s11 + $0x20] sm:$0xff]  ;;  %v897_v11 = vld [vmem:[%s1333_s11 + $0x38] sm:$0xff]  ;;  %v891_v12 = vld [vmem:[%s1333_s11 + $0x8] sm:$0xff]  ;;  %s622_s0 = scvt.s32.f32 %s621_s3 }
  0x5b   : > { %v895_v13 = vld [vmem:[%s1333_s11 + $0x28] sm:$0xff]  ;;  %v892_v14 = vld [vmem:[%s1333_s11 + $0x10] sm:$0xff] }
  0x5c   : > { %s624_s10 = ssub.f32 1.0, %s622_s0 }
  0x5d   : > { %902 = vmatpush.bf16.msra.mxu2 %v898_v6  ;;  %903 = vmatpush.bf16.msra.mxu3 %v898_v6 }
  0x5e   : > { %525 = vmatpush.bf16.msra.mxu0 %v898_v6  ;;  %v439_v6 = vld [vmem:[%s1338_s1] sm:$0xff]  ;;  %s623_s1 = ssub.f32 2.0, %s622_s0 }
  0x60   : > { %879 = vmatmul.msk.bf16.vlgmr.msra.gmra.mxu2 %vm493_vm0, %v893_v7  ;;  %882 = vmatmul.msk.bf16.vlgmr.msra.gmra.mxu3 %vm493_vm0, %v896_v8  ;;  %v607_v8 = vpack.c.bf16 %v439_v6, %v439_v6 }
  0x61   : > { %876 = vmatmul.msk.bf16.vlgmr.msra.gmra.mxu0 %vm493_vm0, %v890_v9  ;;  %v440_v9 = vld [vmem:[%s1345_s23] sm:$0xff] }
  0x70   : > { %880 = vmatmul.msk.bf16.gmra.mxu2 %vm493_vm0, %v894_v10  ;;  %883 = vmatmul.msk.bf16.gmra.mxu3 %vm493_vm0, %v897_v11  ;;  %v635_v10 = vrot.slane %v440_v9, 7 }
  0x71   : > { %877 = vmatmul.msk.bf16.gmra.mxu0 %vm493_vm0, %v891_v12  ;;  %v638_v12 = vstv %s624_s10 }
  0x80   : > { %881 = vmatmul.msk.bf16.gmra.mxu2 %vm493_vm0, %v895_v13 }
  0x81   : > { %878 = vmatmul.msk.bf16.gmra.mxu0 %vm493_vm0, %v892_v14 }
  0xde   : > { %v527_v15 = vpop.f32.mrf.mxu0 }
  0xdf   : > { %v567_v58 = vmul.f32 1.442695, %v527_v15 }
  0xe3   : > { %v542_v16 = vpop.f32.mrf.mxu2  ;;  %v557_v17 = vpop.f32.mrf.mxu3 }
  0xe4   : > { %v591_v27 = vmul.f32 1.442695, %v557_v17  ;;  %v579_v46 = vmul.f32 1.442695, %v542_v16 }
  0xe6   : > { %v529_v18 = vpop.f32.mrf.mxu0 }
  0xe7   : > { %v569_v60 = vmul.f32 1.442695, %v529_v18 }
  0xeb   : > { %v544_v19 = vpop.f32.mrf.mxu2  ;;  %v559_v20 = vpop.f32.mrf.mxu3 }
  0xec   : > { %v593_v29 = vmul.f32 1.442695, %v559_v20  ;;  %v581_v44 = vmul.f32 1.442695, %v544_v19 }
  0xee   : > { %v532_v21 = vpop.f32.mrf.mxu0 }
  0xef   : > { %v571_v53 = vmul.f32 1.442695, %v532_v21 }
  0xf3   : > { %v547_v22 = vpop.f32.mrf.mxu2  ;;  %v562_v23 = vpop.f32.mrf.mxu3 }
  0xf4   : > { %v595_v24 = vmul.f32 1.442695, %v562_v23  ;;  %v583_v43 = vmul.f32 1.442695, %v547_v22 }
  0xf6   : > { %996 = vpow2.f32 %v595_v24  ;;  %v534_v30 = vpop.f32.mrf.mxu0 }
  0xf7   : > { %v573_v55 = vmul.f32 1.442695, %v534_v30 }
  0xfb   : > { %v549_v25 = vpop.f32.mrf.mxu2  ;;  %v564_v26 = vpop.f32.mrf.mxu3 }
  0xfc   : > { %v597_v28 = vmul.f32 1.442695, %v564_v26  ;;  %v997_v31 = vpop.eup %996  ;;  %v585_v41 = vmul.f32 1.442695, %v549_v25  ;;  %v645_v25 = vstv %s623_s1 }
  0xfe   : > { %998 = vpow2.f32 %v597_v28  ;;  %v537_v37 = vpop.f32.mrf.mxu0  ;;  %v644_v28 = vld [vmem:[#allocation2] sm:$0x1] }
  0xff   : > { %1000 = vpow2.f32 %v591_v27  ;;  %v575_v48 = vmul.f32 1.442695, %v537_v37  ;;  %v649_v27 = vld [vmem:[#allocation3] sm:$0x1] }
 0x100   : > { %1002 = vpow2.f32 %v593_v29 }
 0x103   : > { %v552_v32 = vpop.f32.mrf.mxu2 }
 0x104   : > { %v999_v33 = vpop.eup %998  ;;  %v587_v38 = vmul.f32 1.442695, %v552_v32 }
 0x105   : > { %v1001_v34 = vpop.eup %1000  ;;  %v606_v35 = vpack.c.bf16 %v999_v33, %v997_v31 }
 0x106   : > { %v1003_v36 = vpop.eup %1002  ;;  %1004 = vpow2.f32 %v587_v38  ;;  %v539_v45 = vpop.f32.mrf.mxu0 }
 0x107   : > { %608 = vmatpush.bf16.msra.mxu1 %v606_v35  ;;  %v605_v39 = vpack.c.bf16 %v1003_v36, %v1001_v34  ;;  %v577_v50 = vmul.f32 1.442695, %v539_v45 }
 0x10b   : > { %v554_v40 = vpop.f32.mrf.mxu2  ;;  %609 = vmatpush.bf16.msra.mxu1 %v605_v39 }
 0x10c   : > { %v589_v42 = vmul.f32 1.442695, %v554_v40  ;;  %v1005_v47 = vpop.eup %1004 }
 0x10e   : > { %1006 = vpow2.f32 %v589_v42 }
 0x10f   : > { %1008 = vpow2.f32 %v585_v41 }
 0x110   : > { %1010 = vpow2.f32 %v583_v43 }
 0x111   : > { %1012 = vpow2.f32 %v581_v44 }
 0x112   : > { %1014 = vpow2.f32 %v579_v46 }
 0x113   : > { %1016 = vpow2.f32 %v575_v48 }
 0x114   : > { %v1007_v49 = vpop.eup %1006  ;;  %1018 = vpow2.f32 %v577_v50 }
 0x115   : > { %v604_v51 = vpack.c.bf16 %v1007_v49, %v1005_v47  ;;  %v1009_v52 = vpop.eup %1008  ;;  %1020 = vpow2.f32 %v571_v53 }
 0x116   : > { %v1011_v54 = vpop.eup %1010  ;;  %1022 = vpow2.f32 %v573_v55 }
 0x117   : > { %610 = vmatpush.bf16.msra.mxu1 %v604_v51  ;;  %v603_v56 = vpack.c.bf16 %v1009_v52, %v1011_v54  ;;  %v1013_v57 = vpop.eup %1012  ;;  %1024 = vpow2.f32 %v567_v58 }
 0x118   : > { %v1015_v59 = vpop.eup %1014  ;;  %1026 = vpow2.f32 %v569_v60 }
 0x119   : > { %v1017_v61 = vpop.eup %1016  ;;  %v602_v62 = vpack.c.bf16 %v1013_v57, %v1015_v59 }
 0x11a   : > { %v1019_v63 = vpop.eup %1018 }
 0x11b   : > { %611 = vmatpush.bf16.msra.mxu1 %v603_v56  ;;  %v1021_v0 = vpop.eup %1020  ;;  %v601_v1 = vpack.c.bf16 %v1019_v63, %v1017_v61 }
 0x11c   : > { %v1023_v2 = vpop.eup %1022 }
 0x11d   : > { %v1025_v3 = vpop.eup %1024  ;;  %v600_v4 = vpack.c.bf16 %v1023_v2, %v1021_v0 }
 0x11e   : > { %v1027_v5 = vpop.eup %1026 }
 0x11f   : > { %612 = vmatpush.bf16.msra.mxu1 %v602_v62  ;;  %v599_v7 = vpack.c.bf16 %v1027_v5, %v1025_v3 }
 0x123   : > { %613 = vmatpush.bf16.msra.mxu1 %v601_v1 }
 0x127   : > { %614 = vmatpush.bf16.msra.mxu1 %v600_v4 }
 0x12b   : > { %615 = vmatpush.bf16.msra.mxu1 %v599_v7 }
 0x12e   : > { %616 = vmatmul.bf16.vlgmr.msra.gmra.mxu1 %v607_v8 }
 0x1ab   : > { %v617_v11 = vpop.f32.mrf.mxu1 }
 0x1ac   : > { %v625_v13 = vmul.f32 %v617_v11, %v440_v9  ;;  %v637_v14 = vmul.f32 %v635_v10, %v617_v11 }
 0x1ae   : > { %v627_v15 = vsel %vm626_vm1, %v625_v13, 0.0  ;;  %v639_v16 = vmul.f32 %v638_v12, %v637_v14 }
 0x1af   : > { %v628_v17 = vrot.slane %v627_v15, 4 }
 0x1b0   : > { %v641_v18 = vrot.slane %v639_v16, 1 }
 0x1b1   : > { %v629_v19 = vadd.f32 %v628_v17, %v627_v15 }
 0x1b2   : > { %v643_v20 = vadd.f32 %v641_v18, %v617_v11 }
 0x1b3   : > { %v630_v21 = vrot.slane %v629_v19, 2  ;;  %v619_v22 = vpop.f32.mrf.mxu1 }
 0x1b4   : > { %651 = vst [vmem:[#allocation1] sm:$0xff] %v643_v20 }
 0x1b5   : > { %v631_v23 = vadd.f32 %v630_v21, %v629_v19 }
 0x1b7   : > { %v632_v24 = vrot.slane %v631_v23, 1 }
 0x1b9   : > { %v633_v26 = vadd.f32 %v632_v24, %v631_v23 }
 0x1bb   : > { %v646_v29 = vmul.f32 %v645_v25, %v633_v26  ;;  %v653_v30 = vld [vmem:[#allocation1 + $0x4] ss:$9 sm:$0xff]  ;;  %660 = sbr.rel (%p884_p10) target bundleno = 456 (0x1c8), region = 85 }
 0x1bc   : > { %v655_v31 = vadd.f32 %v653_v30, %v649_v27 }
 0x1bd   : > { %v647_v32 = vadd.f32 %v646_v29, %v644_v28 }
 0x1be   : > { %656 = vst [vmem:[#allocation3] sm:$0x1] %v655_v31 }
 0x1bf   : > { %648 = vst [vmem:[#allocation2] sm:$0x1] %v647_v32 }
 0x1c5   : > { %v663_v34 = vld [vmem:[#allocation3] sm:$0x1] }
 0x1c6   : > { %v661_v33 = vld [vmem:[#allocation2] sm:$0x1]  ;;  %664 = vst [vmem:[%s1348_s5 + $0x1] sm:$0x1] %v663_v34 }
 0x1c7   : > { %662 = vst [vmem:[%s1348_s5] sm:$0x1] %v661_v33 }
 0x1c8 PF: > { %s904_s11 = scalar_select %p1288_p8, [#allocation5], [#allocation10] }
 0x1c9   : > { %s1484_s8 = smov (!%p1288_p8, %s1148_s8), 0  ;;  %s886_s16 = sshll.u32 %s1152_s9, 1 }
 0x1ca   : > { %s673_s15 = sld [smem:[%s904_s11 + %s1484_s8]]  ;;  %s681_s25 = sshll.u32 %s1348_s5, 4  ;;  %s682_s25 = int_to_ptr.vmem [resolvable:$true] %s681_s25 }
 0x1cb   : > { %s1457_s20 = sld [smem:[#allocation24_spill]]  ;;  %s1458_s21 = sand.u32 1, %s1132_s30  }
 0x1cc   : > { %s666_s13 = scalar_lea.sflag [#allocation9], %s1458_s21 }
 0x1d0   : > { %s677_s26 = sadd.s32 %s886_s16, %s673_s15 }
 0x1d1   : > { %s887_s28 = sshll.u32 %s677_s26, 1  ;;  %s1072_s9 = scalar_lea.hbm %s1457_s20, 8 }
 0x1d2   : > { %s679_s22 = scalar_lea.hbm %s1457_s20, %s887_s28 }
 0x1d3   : > { %s683_s24 = sshll.u32 %s679_s22, 4  ;;  %s684_s24 = int_to_ptr.hbm [resolvable:$true] %s683_s24 }
 0x1d4   : > { %s1066_s18 = sshra.s32 %s684_s24, 4  ;;  %s1067_s18 = int_to_ptr.hbm [resolvable:$true] %s1066_s18 }
 0x1d5   : > { %s1068_s19 = scalar_lea.hbm %s1067_s18, 2  ;;  %p1073_p1 = scmp.lt.s32.totalorder %s1067_s18, %s1457_s20 }
 0x1d6   : > { %p1069_p11 = scmp.ne.s32.totalorder %s1067_s18, %s1068_s19  ;;  %p1074_p2 = scmp.lt.s32.totalorder %s1072_s9, %s1068_s19 }
 0x1d8   : > { %p1070_p13 = pnand %p1069_p11, %p1288_p8  ;;  %p1075_p3 = por %p1074_p2, %p1073_p1 }
 0x1da   : > { %p1071_p0 = pneg %p1070_p13 }
 0x1dc   : > { %p1076_p4 = pnand %p1075_p3, %p1071_p0 }
 0x1de   : > { %1079 = shalt.err (!%p1076_p4)
}
 0x1df   : > { %906 = dma.vmem_to_hbm [thread:$0]  (%p1288_p8), %s682_s25, 32, %s684_s24, %s666_s13  }
 0x1e0 PF: > { %p912_p5 = scmp.ge.s32.totalorder %s1164_s12, 2  ;;  %s695_s3 = sand.u32 1, %s1128_s29  }
 0x1e1   : > { %s696_s0 = scalar_lea.sflag [#allocation9], %s695_s3 }
 0x1e2   : > { %p909_p6 = pnand %p912_p5, %p1295_p12 }
 0x1e4   : > { %p910_p7 = pneg %p909_p6 }
 0x1e6   : > { %1123 = dma.done.wait (%p910_p7), %s696_s0, 32  }
 0x1e7   : > { %1125 = vsyncadd (%p910_p7), %s696_s0, 4294967264  ;;  %s32_s12 = sadd.s32 1, %s1164_s12   ;;  %s1460_s10 = sld [smem:[#allocation13_spill]] }
 0x1e8   : > { %p29_p9 = scmp.ge.s32.totalorder %s32_s12, 8   ;;  %s1461_s0 = sld [smem:[#allocation21_spill]] }
 0x1e9   : > { %s1462_s7 = sld [smem:[#allocation14_spill]]  ;;  %s1468_s29 = smov %s1132_s30 }
 0x1ea   : > { %s1463_s1 = sld [smem:[#allocation19_spill]] }
 0x1eb   : > { %s1464_s8 = sld [smem:[#allocation15_spill]] }
 0x1ec   : > { %s1465_s9 = sld [smem:[#allocation16_spill]] }
 0x1ed   : > { %s1466_s27 = sld [smem:[#allocation17_spill]]  ;;  %s1469_s30 = smov %s1460_s10 }
 0x1ee   : > { %s1467_s11 = sld [smem:[#allocation18_spill]] }
 0x1ef   :  { %31 = sbr.rel (!%p29_p9) target bundleno = 15 (0xf), region = 135 }
 0x1f3   : > { %s1470_s10 = smov %s1466_s27 }
 0x1f4   :  { %702 = vsyncpa [#allocation9], 1 }
 0x1f5   :  { %704 = vsyncpa [#allocation9 + $0x1], 1 }

</bundles_post_ra>
